<compile_context>
chip_gen: v5e
topology: v5e:2x2
jax: 0.10.0
libtpu: 0.0.40
codegen_flags: <defaults>
</compile_context>

<pallas_src>
import functools
import math

import jax
import jax.numpy as jnp
from jax.experimental import pallas as pl
from jax.experimental.pallas import tpu as pltpu

LANE = 128          # lane width; final layer weights padded once to this
TM_MAX = 1024       # batch tile (rows per grid step)


def _round_up(x, m):
    return ((x + m - 1) // m) * m


def _mlp_kernel(out_size,
                x_ref,
                w1_ref, b1_ref,
                w2_ref, b2_ref,
                w3_ref, b3_ref,
                w4_ref, b4_ref,
                o_ref):
    # layer 1: bf16 operands on the MXU, f32 accumulation; bias/ReLU in f32 (VPU)
    h = jnp.dot(x_ref[...].astype(jnp.bfloat16), w1_ref[...],
                preferred_element_type=jnp.float32)
    h = jnp.maximum(h + b1_ref[...], 0.0)
    # layer 2
    h = jnp.dot(h.astype(jnp.bfloat16), w2_ref[...],
                preferred_element_type=jnp.float32)
    h = jnp.maximum(h + b2_ref[...], 0.0)
    # layer 3
    h = jnp.dot(h.astype(jnp.bfloat16), w3_ref[...],
                preferred_element_type=jnp.float32)
    h = jnp.maximum(h + b3_ref[...], 0.0)
    # layer 4 (no activation); weight columns >= out_size are zero padding,
    # computed on the MXU but never written back to HBM.
    h = jnp.dot(h.astype(jnp.bfloat16), w4_ref[...],
                preferred_element_type=jnp.float32)
    h = h + b4_ref[...]
    o_ref[...] = h[:, :out_size].astype(o_ref.dtype)


def mlp_forward(x, kernel_params, out_size, *, tm_max=TM_MAX):
    """x: [B, input_size] (f32 or bf16); kernel_params: output of pad_final_layer."""
    (w1, b1), (w2, b2), (w3, b3), (w4p, b4p) = kernel_params
    B, in_size = x.shape
    out_pad = w4p.shape[1]
    h1, h2, h3 = w1.shape[1], w2.shape[1], w3.shape[1]

    # Batch tiling: weight-stationary grid over the batch axis.
    tm = min(tm_max, _round_up(B, 8))
    # v7x has 2 TensorCores: make sure the "parallel" batch axis has >= 2 grid
    # steps whenever there is enough work to split (harmless on v5e / v6e).
    if B >= 16:
        tm = min(tm, _round_up((B + 1) // 2, 8))
    b_pad = _round_up(B, tm)
    if b_pad != B:
        x = jnp.pad(x, ((0, b_pad - B), (0, 0)))
    grid = (b_pad // tm,)

    def resident(arr):
        # Constant block index -> stays in VMEM, DMA'd once across the grid.
        return pl.BlockSpec(arr.shape, lambda i: (0, 0))

    # Advisory cost estimate so XLA can overlap this kernel with neighbors.
    flops = 2 * b_pad * (in_size * h1 + h1 * h2 + h2 * h3 + h3 * out_pad)
    bytes_w = sum(int(w.size) * w.dtype.itemsize + int(b.size) * b.dtype.itemsize
                  for (w, b) in kernel_params)
    bytes_io = b_pad * in_size * x.dtype.itemsize + b_pad * out_size * 4
    cost = pl.CostEstimate(flops=int(flops), transcendentals=0,
                           bytes_accessed=int(bytes_w + bytes_io))

    out = pl.pallas_call(
        functools.partial(_mlp_kernel, out_size),
        out_shape=jax.ShapeDtypeStruct((b_pad, out_size), jnp.float32),
        grid_spec=pltpu.PrefetchScalarGridSpec(
            num_scalar_prefetch=0,
            grid=grid,
            in_specs=[
                pl.BlockSpec((tm, in_size), lambda i: (i, 0)),
                resident(w1), resident(b1),
                resident(w2), resident(b2),
                resident(w3), resident(b3),
                resident(w4p), resident(b4p),
            ],
            out_specs=pl.BlockSpec((tm, out_size), lambda i: (i, 0)),
        ),
        compiler_params=pltpu.CompilerParams(
            dimension_semantics=("parallel",),
            vmem_limit_bytes=32 * 1024 * 1024,
        ),
        cost_estimate=cost,
    )(x, w1, b1, w2, b2, w3, b3, w4p, b4p)

    return out[:B]


def _xavier_uniform(key, fan_in, fan_out):
    # matches nn.init.xavier_uniform_ (gain=1); stored (in, out) for x @ W + b
    bound = math.sqrt(6.0 / (fan_in + fan_out))
    w = jax.random.uniform(key, (fan_in, fan_out), jnp.float32, -bound, bound)
    return w.astype(jnp.bfloat16)  # bf16 MXU operands


def _linear_bias(key, fan_in, fan_out):
    # PyTorch nn.Linear default bias init: U(-1/sqrt(fan_in), 1/sqrt(fan_in))
    bound = 1.0 / math.sqrt(fan_in)
    return jax.random.uniform(key, (1, fan_out), jnp.float32, -bound, bound)


def init_params(key, input_size, output_size):
    dims = [(input_size, 512), (512, 256), (256, 128), (128, output_size)]
    params = []
    for (fi, fo) in dims:
        key, kw, kb = jax.random.split(key, 3)
        params.append((_xavier_uniform(kw, fi, fo), _linear_bias(kb, fi, fo)))
    return params


def pad_final_layer(params):
    """One-time (init-time) padding of the last layer to a lane multiple.

    Hoisted out of mlp_forward so no per-call pad/scatter hits HBM.
    """
    (w1, b1), (w2, b2), (w3, b3), (w4, b4) = params
    out_size = w4.shape[1]
    out_pad = _round_up(max(out_size, LANE), LANE)
    w4p = jnp.zeros((w4.shape[0], out_pad), w4.dtype).at[:, :out_size].set(w4)
    b4p = jnp.zeros((1, out_pad), b4.dtype).at[:, :out_size].set(b4)
    return [(w1, b1), (w2, b2), (w3, b3), (w4p, b4p)]


def reference_forward_bf16(x, params):
    # Exact arithmetic the kernel performs (bf16 operands, f32 accumulation).
    h = x
    for i, (w, b) in enumerate(params):
        h = jnp.dot(h.astype(jnp.bfloat16), w.astype(jnp.bfloat16),
                    preferred_element_type=jnp.float32) + b
        if i < 3:
            h = jnp.maximum(h, 0.0)
    return h


def reference_forward_f32(x, params):
    # Full-precision PyTorch-equivalent forward (loose sanity check; the kernel
    # keeps weights in bf16, so this only matches to ~1e-1).
    h = x
    for i, (w, b) in enumerate(params):
        h = h @ w.astype(jnp.float32) + b
        if i < 3:
            h = jnp.maximum(h, 0.0)
    return h


if __name__ == "__main__":
    input_size = 32
    output_size = 4

    key = jax.random.PRNGKey(0)
    key, kx1, kx2 = jax.random.split(key, 3)
    params = init_params(key, input_size, output_size)
    kernel_params = pad_final_layer(params)   # padding hoisted to init

    # Small case (single grid step).
    x_small = jax.random.normal(kx1, (8, input_size), jnp.float32)
    out_small = jax.block_until_ready(
        mlp_forward(x_small, kernel_params, output_size))
    assert out_small.shape == (8, output_size)
    assert jnp.allclose(out_small, reference_forward_bf16(x_small, params),
                        atol=2e-3, rtol=2e-3), "mismatch vs bf16 reference"
    assert jnp.allclose(out_small, reference_forward_f32(x_small, params),
                        atol=1e-1, rtol=1e-1), "mismatch vs f32 reference"

    # Larger batch: exercises the >=2-step grid (v7x megacore path) and
    # multi-step weight residency.
    x_big = jax.random.normal(kx2, (384, input_size), jnp.float32)
    out_big = jax.block_until_ready(
        mlp_forward(x_big, kernel_params, output_size))
    assert out_big.shape == (384, output_size)
    assert jnp.allclose(out_big, reference_forward_bf16(x_big, params),
                        atol=2e-3, rtol=2e-3), "mismatch vs bf16 reference (big)"

    # Non-multiple-of-tile batch: exercises batch padding.
    x_odd = jax.random.normal(kx1, (50, input_size), jnp.float32)
    out_odd = jax.block_until_ready(
        mlp_forward(x_odd, kernel_params, output_size))
    assert out_odd.shape == (50, output_size)
    assert jnp.allclose(out_odd, reference_forward_bf16(x_odd, params),
                        atol=2e-3, rtol=2e-3), "mismatch vs bf16 reference (odd)"

    print("KERNEL_OK")
</pallas_src>

<mosaic_0001>
module attributes {stable_mosaic.version = 11 : i64} {
  func.func @_mlp_kernel(%arg0: i32, %arg1: memref<8x32xf32, #tpu.memory_space<vmem>>, %arg2: memref<32x512xbf16, #tpu.memory_space<vmem>>, %arg3: memref<1x512xf32, #tpu.memory_space<vmem>>, %arg4: memref<512x256xbf16, #tpu.memory_space<vmem>>, %arg5: memref<1x256xf32, #tpu.memory_space<vmem>>, %arg6: memref<256x128xbf16, #tpu.memory_space<vmem>>, %arg7: memref<1x128xf32, #tpu.memory_space<vmem>>, %arg8: memref<128x128xbf16, #tpu.memory_space<vmem>>, %arg9: memref<1x128xf32, #tpu.memory_space<vmem>>, %arg10: memref<8x4xf32, #tpu.memory_space<vmem>>) attributes {dimension_semantics = [#tpu.dimension_semantics<parallel>], iteration_bounds = array<i64: 1>, scalar_prefetch = 0 : i64, scratch_operands = 0 : i64, tpu.core_type = #tpu.core_type<tc>, window_params = [{transform_indices = @transform_0, window_bounds = array<i64: 8, 32>}, {pipeline_mode = #tpu.pipeline_mode<synchronous>, transform_indices = @transform_1, window_bounds = array<i64: 32, 512>}, {pipeline_mode = #tpu.pipeline_mode<synchronous>, transform_indices = @transform_2, window_bounds = array<i64: 1, 512>}, {pipeline_mode = #tpu.pipeline_mode<synchronous>, transform_indices = @transform_3, window_bounds = array<i64: 512, 256>}, {pipeline_mode = #tpu.pipeline_mode<synchronous>, transform_indices = @transform_4, window_bounds = array<i64: 1, 256>}, {pipeline_mode = #tpu.pipeline_mode<synchronous>, transform_indices = @transform_5, window_bounds = array<i64: 256, 128>}, {pipeline_mode = #tpu.pipeline_mode<synchronous>, transform_indices = @transform_6, window_bounds = array<i64: 1, 128>}, {pipeline_mode = #tpu.pipeline_mode<synchronous>, transform_indices = @transform_7, window_bounds = array<i64: 128, 128>}, {pipeline_mode = #tpu.pipeline_mode<synchronous>, transform_indices = @transform_8, window_bounds = array<i64: 1, 128>}, {transform_indices = @transform_9, window_bounds = array<i64: 8, 4>}]} {
    %c0 = arith.constant 0 : index
    %c0_0 = arith.constant 0 : index
    %0 = vector.load %arg1[%c0, %c0_0] : memref<8x32xf32, #tpu.memory_space<vmem>>, vector<8x32xf32>
    %1 = arith.truncf %0 : vector<8x32xf32> to vector<8x32xbf16>
    %c0_1 = arith.constant 0 : index
    %c0_2 = arith.constant 0 : index
    %2 = vector.load %arg2[%c0_1, %c0_2] : memref<32x512xbf16, #tpu.memory_space<vmem>>, vector<32x512xbf16>
    %cst = arith.constant dense<0.000000e+00> : vector<8x512xf32>
    %3 = tpu.matmul %1, %2, %cst {dimension_numbers = #tpu.dot_dimension_numbers<[1], [0], [0], [1], [0, 0, 1, 1], [], []>} : vector<8x32xbf16>, vector<32x512xbf16>, vector<8x512xf32> -> vector<8x512xf32>
    %c0_3 = arith.constant 0 : index
    %c0_4 = arith.constant 0 : index
    %4 = vector.load %arg3[%c0_3, %c0_4] : memref<1x512xf32, #tpu.memory_space<vmem>>, vector<1x512xf32>
    %5 = vector.broadcast %4 : vector<1x512xf32> to vector<8x512xf32>
    %6 = arith.addf %3, %5 : vector<8x512xf32>
    %cst_5 = arith.constant 0.000000e+00 : f32
    %7 = vector.broadcast %cst_5 : f32 to vector<8x512xf32>
    %8 = arith.maximumf %6, %7 : vector<8x512xf32>
    %9 = arith.truncf %8 : vector<8x512xf32> to vector<8x512xbf16>
    %c0_6 = arith.constant 0 : index
    %c0_7 = arith.constant 0 : index
    %10 = vector.load %arg4[%c0_6, %c0_7] : memref<512x256xbf16, #tpu.memory_space<vmem>>, vector<512x256xbf16>
    %cst_8 = arith.constant dense<0.000000e+00> : vector<8x256xf32>
    %11 = tpu.matmul %9, %10, %cst_8 {dimension_numbers = #tpu.dot_dimension_numbers<[1], [0], [0], [1], [0, 0, 1, 1], [], []>} : vector<8x512xbf16>, vector<512x256xbf16>, vector<8x256xf32> -> vector<8x256xf32>
    %c0_9 = arith.constant 0 : index
    %c0_10 = arith.constant 0 : index
    %12 = vector.load %arg5[%c0_9, %c0_10] : memref<1x256xf32, #tpu.memory_space<vmem>>, vector<1x256xf32>
    %13 = vector.broadcast %12 : vector<1x256xf32> to vector<8x256xf32>
    %14 = arith.addf %11, %13 : vector<8x256xf32>
    %cst_11 = arith.constant 0.000000e+00 : f32
    %15 = vector.broadcast %cst_11 : f32 to vector<8x256xf32>
    %16 = arith.maximumf %14, %15 : vector<8x256xf32>
    %17 = arith.truncf %16 : vector<8x256xf32> to vector<8x256xbf16>
    %c0_12 = arith.constant 0 : index
    %c0_13 = arith.constant 0 : index
    %18 = vector.load %arg6[%c0_12, %c0_13] : memref<256x128xbf16, #tpu.memory_space<vmem>>, vector<256x128xbf16>
    %cst_14 = arith.constant dense<0.000000e+00> : vector<8x128xf32>
    %19 = tpu.matmul %17, %18, %cst_14 {dimension_numbers = #tpu.dot_dimension_numbers<[1], [0], [0], [1], [0, 0, 1, 1], [], []>} : vector<8x256xbf16>, vector<256x128xbf16>, vector<8x128xf32> -> vector<8x128xf32>
    %c0_15 = arith.constant 0 : index
    %c0_16 = arith.constant 0 : index
    %20 = vector.load %arg7[%c0_15, %c0_16] : memref<1x128xf32, #tpu.memory_space<vmem>>, vector<1x128xf32>
    %21 = vector.broadcast %20 : vector<1x128xf32> to vector<8x128xf32>
    %22 = arith.addf %19, %21 : vector<8x128xf32>
    %cst_17 = arith.constant 0.000000e+00 : f32
    %23 = vector.broadcast %cst_17 : f32 to vector<8x128xf32>
    %24 = arith.maximumf %22, %23 : vector<8x128xf32>
    %25 = arith.truncf %24 : vector<8x128xf32> to vector<8x128xbf16>
    %c0_18 = arith.constant 0 : index
    %c0_19 = arith.constant 0 : index
    %26 = vector.load %arg8[%c0_18, %c0_19] : memref<128x128xbf16, #tpu.memory_space<vmem>>, vector<128x128xbf16>
    %cst_20 = arith.constant dense<0.000000e+00> : vector<8x128xf32>
    %27 = tpu.matmul %25, %26, %cst_20 {dimension_numbers = #tpu.dot_dimension_numbers<[1], [0], [0], [1], [0, 0, 1, 1], [], []>} : vector<8x128xbf16>, vector<128x128xbf16>, vector<8x128xf32> -> vector<8x128xf32>
    %c0_21 = arith.constant 0 : index
    %c0_22 = arith.constant 0 : index
    %28 = vector.load %arg9[%c0_21, %c0_22] : memref<1x128xf32, #tpu.memory_space<vmem>>, vector<1x128xf32>
    %29 = vector.broadcast %28 : vector<1x128xf32> to vector<8x128xf32>
    %30 = arith.addf %27, %29 : vector<8x128xf32>
    %31 = vector.extract_strided_slice %30 {offsets = [0, 0], sizes = [8, 4], strides = [1, 1]} : vector<8x128xf32> to vector<8x4xf32>
    %c0_23 = arith.constant 0 : index
    %c0_24 = arith.constant 0 : index
    %32 = vector.load %arg10[%c0_23, %c0_24] : memref<8x4xf32, #tpu.memory_space<vmem>>, vector<8x4xf32>
    tpu.vector_store %arg10[%c0_23, %c0_24], %31 {strides = array<i32>} : memref<8x4xf32, #tpu.memory_space<vmem>>, vector<8x4xf32>,
    return
  }
  func.func @transform_0(%arg0: i32) -> (i32, i32) {
    %c0_i32 = arith.constant 0 : i32
    %c0_i32_0 = arith.constant 0 : i32
    return %arg0, %c0_i32 : i32, i32
  }
  func.func @transform_1(%arg0: i32) -> (i32, i32) {
    %c0_i32 = arith.constant 0 : i32
    %c0_i32_0 = arith.constant 0 : i32
    %c0_i32_1 = arith.constant 0 : i32
    return %c0_i32, %c0_i32_0 : i32, i32
  }
  func.func @transform_2(%arg0: i32) -> (i32, i32) {
    %c0_i32 = arith.constant 0 : i32
    %c0_i32_0 = arith.constant 0 : i32
    %c0_i32_1 = arith.constant 0 : i32
    return %c0_i32, %c0_i32_0 : i32, i32
  }
  func.func @transform_3(%arg0: i32) -> (i32, i32) {
    %c0_i32 = arith.constant 0 : i32
    %c0_i32_0 = arith.constant 0 : i32
    %c0_i32_1 = arith.constant 0 : i32
    return %c0_i32, %c0_i32_0 : i32, i32
  }
  func.func @transform_4(%arg0: i32) -> (i32, i32) {
    %c0_i32 = arith.constant 0 : i32
    %c0_i32_0 = arith.constant 0 : i32
    %c0_i32_1 = arith.constant 0 : i32
    return %c0_i32, %c0_i32_0 : i32, i32
  }
  func.func @transform_5(%arg0: i32) -> (i32, i32) {
    %c0_i32 = arith.constant 0 : i32
    %c0_i32_0 = arith.constant 0 : i32
    %c0_i32_1 = arith.constant 0 : i32
    return %c0_i32, %c0_i32_0 : i32, i32
  }
  func.func @transform_6(%arg0: i32) -> (i32, i32) {
    %c0_i32 = arith.constant 0 : i32
    %c0_i32_0 = arith.constant 0 : i32
    %c0_i32_1 = arith.constant 0 : i32
    return %c0_i32, %c0_i32_0 : i32, i32
  }
  func.func @transform_7(%arg0: i32) -> (i32, i32) {
    %c0_i32 = arith.constant 0 : i32
    %c0_i32_0 = arith.constant 0 : i32
    %c0_i32_1 = arith.constant 0 : i32
    return %c0_i32, %c0_i32_0 : i32, i32
  }
  func.func @transform_8(%arg0: i32) -> (i32, i32) {
    %c0_i32 = arith.constant 0 : i32
    %c0_i32_0 = arith.constant 0 : i32
    %c0_i32_1 = arith.constant 0 : i32
    return %c0_i32, %c0_i32_0 : i32, i32
  }
  func.func @transform_9(%arg0: i32) -> (i32, i32) {
    %c0_i32 = arith.constant 0 : i32
    %c0_i32_0 = arith.constant 0 : i32
    return %arg0, %c0_i32 : i32, i32
  }
}

</mosaic_0001>

<bundles_post_ra>
// kernel: tpu_custom_call.1
= control target key start
LH: loop header
LB: loop body
LE: loop exit
PB: predicated region body
PF: predicated region fallthrough
CT: control target
= control target key end

     0   :  { %14 = vsyncpa [#allocation3], 0  ;;  %s1748_s0 = inlined_call_operand.hbm [shape: f32[8,32], index: 0, kind: input, shape index: {}]   ;;  %s1749_s1 = inlined_call_operand.hbm [shape: bf16[32,512], index: 1, kind: input, shape index: {}]   ;;  %s1750_s2 = inlined_call_operand.hbm [shape: f32[1,512], index: 2, kind: input, shape index: {}]   ;;  %s1751_s3 = inlined_call_operand.hbm [shape: bf16[512,256], index: 3, kind: input, shape index: {}]   ;;  %s1752_s4 = inlined_call_operand.vmem [shape: f32[1,256], index: 4, kind: input, shape index: {}]   ;;  %s1753_s5 = inlined_call_operand.hbm [shape: bf16[256,128], index: 5, kind: input, shape index: {}]   ;;  %s1754_s6 = inlined_call_operand.vmem [shape: f32[1,128], index: 6, kind: input, shape index: {}]   ;;  %s1755_s7 = inlined_call_operand.hbm [shape: bf16[128,128], index: 7, kind: input, shape index: {}]   ;;  %s1756_s8 = inlined_call_operand.vmem [shape: f32[1,128], index: 8, kind: input, shape index: {}]   ;;  %s1757_s9 = inlined_call_operand.vmem [shape: f32[8,4], index: 9, kind: output, shape index: {}]  }
   0x1   :  { %15 = vsyncpa [#allocation5], 0 }
   0x2   :  { %16 = vsyncpa [#allocation8], 0  ;;  %s33_s11 = sshll.u32 %s1749_s1, 4  ;;  %s34_s11 = int_to_ptr.hbm [resolvable:$true] %s33_s11 }
   0x3   :  { %17 = vsyncpa [#allocation11], 0  ;;  %s1646_s12 = smov [#allocation4]   ;;  %s57_s16 = sshll.u32 %s1751_s3, 4  ;;  %s58_s16 = int_to_ptr.hbm [resolvable:$true] %s57_s16 }
   0x4   :  { %s35_s13 = sshll.u32 %s1646_s12, 4  ;;  %s1647_s17 = smov 256   ;;  %s36_s13 = int_to_ptr.vmem [resolvable:$true] %s35_s13 }
   0x5   :  { %s1648_s18 = smov 16   ;;  %s1649_s19 = smov [#allocation7]  }
   0x6   :  { %41 = dma.hbm_to_vmem [thread:$0]  %s34_s11, 1024, %s36_s13, [#allocation5], %s1647_s17, %s1647_s17, %s1648_s18  }
   0x7   :  { %s59_s20 = sshll.u32 %s1649_s19, 4  ;;  %s1650_s21 = smov 128   ;;  %s60_s20 = int_to_ptr.vmem [resolvable:$true] %s59_s20 }
   0x8   :  { %s1651_s22 = smov 8   ;;  %s23_s24 = sshll.u32 %s1748_s0, 4  ;;  %s24_s24 = int_to_ptr.hbm [resolvable:$true] %s23_s24 }
   0x9   :  { %65 = dma.hbm_to_vmem [thread:$0]  %s58_s16, 8192, %s60_s20, [#allocation8], %s1650_s21, %s1650_s21, %s1651_s22  }
   0xa   :  { %s1652_s25 = smov [#allocation2]   ;;  %s47_s28 = sshll.u32 %s1750_s2, 4  ;;  %s48_s28 = int_to_ptr.hbm [resolvable:$true] %s47_s28 }
   0xb   :  { %s25_s26 = sshll.u32 %s1652_s25, 4  ;;  %s1653_s29 = smov [#allocation6]   ;;  %s26_s26 = int_to_ptr.vmem [resolvable:$true] %s25_s26 }
   0xc   :  { %28 = dma.hbm_to_vmem [thread:$0]  %s24_s24, 128, %s26_s26, [#allocation3]  }
   0xd   :  { %s49_s30 = sshll.u32 %s1653_s29, 4  ;;  %s72_s12 = sshll.u32 %s1753_s5, 4  ;;  %s50_s30 = int_to_ptr.vmem [resolvable:$true] %s49_s30  ;;  %s73_s12 = int_to_ptr.hbm [resolvable:$true] %s72_s12 }
   0xe   :  { %52 = dma.hbm_to_vmem [thread:$0]  %s48_s28, 64, %s50_s30, [#allocation5]  }
   0xf   :  { %s1654_s0 = smov [#allocation9]   ;;  %s87_s16 = sshll.u32 %s1755_s7, 4  ;;  %s88_s16 = int_to_ptr.hbm [resolvable:$true] %s87_s16 }
  0x10   :  { %s74_s13 = sshll.u32 %s1654_s0, 4  ;;  %s1655_s17 = smov 64   ;;  %s75_s13 = int_to_ptr.vmem [resolvable:$true] %s74_s13 }
  0x11   :  { %s1656_s2 = smov 4   ;;  %s1657_s18 = smov [#allocation10]  }
  0x12   :  { %80 = dma.hbm_to_vmem [thread:$0]  %s73_s12, 2048, %s75_s13, [#allocation8], %s1655_s17, %s1655_s17, %s1656_s2  }
  0x13   :  { %s89_s19 = sshll.u32 %s1657_s18, 4  ;;  %s90_s19 = int_to_ptr.vmem [resolvable:$true] %s89_s19 }
  0x14   :  { %95 = dma.hbm_to_vmem [thread:$0]  %s88_s16, 1024, %s90_s19, [#allocation11], %s1655_s17, %s1655_s17, %s1656_s2  }
  0x15   :  { %1638 = dma.done.wait [#allocation3], 128  }
  0x16   :  { %1639 = vsyncadd [#allocation3], 4294967168 }
  0x17   :  { %1640 = dma.done.wait [#allocation5], 1088  }
  0x18   :  { %1641 = vsyncadd [#allocation5], 4294966208 }
  0x19   :  { %1642 = dma.done.wait [#allocation8], 10240  }
  0x1a   :  { %1643 = vsyncadd [#allocation8], 4294957056 }
  0x1b   :  { %1644 = dma.done.wait [#allocation11], 1024  }
  0x1c   :  { %1645 = vsyncadd [#allocation11], 4294966272  ;;  %v1014_v0 = vld [vmem:[#allocation4 + $0x20] sm:$0xf]  ;;  %v1390_v1 = vld [vmem:[#allocation4 + $0x2c] sm:$0xf0] }
  0x1d   :  { %v1388_v2 = vld [vmem:[#allocation4 + $0x24] sm:$0xf]  ;;  %v1015_v3 = vor.u32 %v1390_v1, %v1014_v0  ;;  %v1016_v4 = vld [vmem:[#allocation4 + $0x30] sm:$0xf0]  ;;  %v1022_v5 = vld [vmem:[#allocation4 + $0x28] sm:$0xf] }
  0x1e   :  { %v1391_v6 = vld [vmem:[#allocation4 + $0x34] sm:$0xf0]  ;;  %v1019_v7 = vor.u32 %v1388_v2, %v1016_v4  ;;  %v998_v9 = vld [vmem:[#allocation4] sm:$0xf]  ;;  %v1386_v10 = vld [vmem:[#allocation4 + $0xc] sm:$0xf0] }
  0x1f   :  { %v1023_v8 = vor.u32 %v1391_v6, %v1022_v5  ;;  %v1384_v11 = vld [vmem:[#allocation4 + $0x4] sm:$0xf]  ;;  %193 = vmatpush.bf16.msra.mxu3 %v1015_v3  ;;  %v999_v12 = vor.u32 %v1386_v10, %v998_v9  ;;  %v1000_v13 = vld [vmem:[#allocation4 + $0x10] sm:$0xf0]  ;;  %v1006_v14 = vld [vmem:[#allocation4 + $0x8] sm:$0xf] }
  0x20   :  { %v1387_v15 = vld [vmem:[#allocation4 + $0x14] sm:$0xf0]  ;;  %206 = vmatpush.bf16.msra.mxu1 %v1019_v7  ;;  %v1003_v16 = vor.u32 %v1384_v11, %v1000_v13  ;;  %vm183_vm0 = vcmask 261120   ;;  %v1389_v19 = vld [vmem:[#allocation4 + $0x2c] sm:$0xf]  ;;  %vm986_vm1 = vcmask 31744  }
  0x21   :  { %219 = vmatpush.bf16.msra.mxu2 %v1023_v8  ;;  %v1007_v17 = vor.u32 %v1387_v15, %v1006_v14  ;;  %v123_v18 = vld [vmem:[#allocation2] sm:$0xff]  ;;  %v1385_v22 = vld [vmem:[#allocation4 + $0xc] sm:$0xf]  ;;  %v1154_v24 = vld [vmem:[#allocation7 + $0xf0] sm:$0xf] }
  0x22   :  { %v1024_v20 = vld [vmem:[#allocation4 + $0x38] sm:$0xf0]  ;;  %v1726_v25 = vpack.c.bf16 %v123_v18, %v123_v18  ;;  %v1146_v27 = vld [vmem:[#allocation7 + $0xe0] sm:$0xf]  ;;  %v1421_v28 = vld [vmem:[#allocation7 + $0xe4] sm:$0xf0] }
  0x23   :  { %v1027_v21 = vor.u32 %v1389_v19, %v1024_v20  ;;  %v1008_v23 = vld [vmem:[#allocation4 + $0x18] sm:$0xf0]  ;;  %194 = vmatpush.bf16.msra.mxu3 %v999_v12  ;;  %v1090_v30 = vld [vmem:[#allocation7 + $0x70] sm:$0xf]  ;;  %v1147_v36 = vor.u32 %v1421_v28, %v1146_v27  ;;  %v1082_v38 = vld [vmem:[#allocation7 + $0x60] sm:$0xf] }
  0x24   :  { %v1423_v26 = vld [vmem:[#allocation7 + $0xf4] sm:$0xf0]  ;;  %v1218_v32 = vld [vmem:[#allocation7 + $0x170] sm:$0xf]  ;;  %207 = vmatpush.bf16.msra.mxu1 %v1003_v16  ;;  %v1011_v35 = vor.u32 %v1385_v22, %v1008_v23  ;;  %v1405_v39 = vld [vmem:[#allocation7 + $0x64] sm:$0xf0] }
  0x25   :  { %v1155_v29 = vor.u32 %v1423_v26, %v1154_v24  ;;  %v1407_v31 = vld [vmem:[#allocation7 + $0x74] sm:$0xf0]  ;;  %220 = vmatpush.bf16.msra.mxu2 %v1007_v17  ;;  %v1210_v40 = vld [vmem:[#allocation7 + $0x160] sm:$0xf]  ;;  %v1138_v41 = vld [vmem:[#allocation7 + $0xd0] sm:$0xf]  ;;  %v1083_v43 = vor.u32 %v1405_v39, %v1082_v38 }
  0x26   :  { %v1091_v33 = vor.u32 %v1407_v31, %v1090_v30  ;;  %v1439_v34 = vld [vmem:[#allocation7 + $0x174] sm:$0xf0]  ;;  %1028 = vmatmul.msk.bf16.vlgmr.msra.gmra.mxu3 %vm183_vm0, %v1726_v25  ;;  %v1437_v44 = vld [vmem:[#allocation7 + $0x164] sm:$0xf0]  ;;  %v1074_v45 = vld [vmem:[#allocation7 + $0x50] sm:$0xf] }
  0x27   :  { %232 = vmatpush.bf16.msrb.mxu3 %v1027_v21  ;;  %v1219_v37 = vor.u32 %v1439_v34, %v1218_v32  ;;  %v1419_v42 = vld [vmem:[#allocation7 + $0xd4] sm:$0xf0]  ;;  %1029 = vmatmul.msk.bf16.vlgmr.msra.gmra.mxu1 %vm183_vm0, %v1726_v25  ;;  %v1211_v47 = vor.u32 %v1437_v44, %v1210_v40  ;;  %v1202_v49 = vld [vmem:[#allocation7 + $0x150] sm:$0xf]  ;;  %v1130_v51 = vld [vmem:[#allocation7 + $0xc0] sm:$0xf] }
  0x28   :  { %650 = vmatpush.bf16.msrb.mxu1 %v1155_v29  ;;  %637 = vmatpush.bf16.msra.mxu0 %v1091_v33  ;;  %v1403_v46 = vld [vmem:[#allocation7 + $0x54] sm:$0xf0]  ;;  %v1139_v48 = vor.u32 %v1419_v42, %v1138_v41  ;;  %v1417_v52 = vld [vmem:[#allocation7 + $0xc4] sm:$0xf0]  ;;  %v1066_v54 = vld [vmem:[#allocation7 + $0x40] sm:$0xf] }
  0x29   :  { %1030 = vmatmul.msk.bf16.vlgmr.msra.gmra.mxu2 %vm183_vm0, %v1726_v25  ;;  %v1435_v50 = vld [vmem:[#allocation7 + $0x154] sm:$0xf0]  ;;  %v1075_v53 = vor.u32 %v1403_v46, %v1074_v45  ;;  %v1401_v55 = vld [vmem:[#allocation7 + $0x44] sm:$0xf0]  ;;  %v1282_v57 = vld [vmem:[#allocation7 + $0x1f0] sm:$0xf]  ;;  %v1131_v59 = vor.u32 %v1417_v52, %v1130_v51 }
  0x2a   :  { %663 = vmatpush.bf16.msrb.mxu2 %v1219_v37  ;;  %v1203_v56 = vor.u32 %v1435_v50, %v1202_v49  ;;  %v1455_v58 = vld [vmem:[#allocation7 + $0x1f4] sm:$0xf0]  ;;  %v1194_v60 = vld [vmem:[#allocation7 + $0x140] sm:$0xf]  ;;  %v1433_v61 = vld [vmem:[#allocation7 + $0x144] sm:$0xf0]  ;;  %v1067_v1 = vor.u32 %v1401_v55, %v1066_v54 }
  0x2b   :  { %233 = vmatpush.bf16.msrb.mxu3 %v1011_v35  ;;  %v1283_v62 = vor.u32 %v1455_v58, %v1282_v57  ;;  %v1122_v63 = vld [vmem:[#allocation7 + $0xb0] sm:$0xf]  ;;  %v1415_v0 = vld [vmem:[#allocation7 + $0xb4] sm:$0xf0]  ;;  %v1274_v4 = vld [vmem:[#allocation7 + $0x1e0] sm:$0xf]  ;;  %v1195_v6 = vor.u32 %v1433_v61, %v1194_v60 }
  0x2c   :  { %651 = vmatpush.bf16.msrb.mxu1 %v1147_v36  ;;  %638 = vmatpush.bf16.msra.mxu0 %v1083_v43  ;;  %v1058_v2 = vld [vmem:[#allocation7 + $0x30] sm:$0xf]  ;;  %v1399_v3 = vld [vmem:[#allocation7 + $0x34] sm:$0xf0]  ;;  %v1453_v5 = vld [vmem:[#allocation7 + $0x1e4] sm:$0xf0]  ;;  %v1123_v8 = vor.u32 %v1415_v0, %v1122_v63 }
  0x2d   :  { %v1275_v7 = vor.u32 %v1453_v5, %v1274_v4  ;;  %v1114_v9 = vld [vmem:[#allocation7 + $0xa0] sm:$0xf]  ;;  %v1186_v10 = vld [vmem:[#allocation7 + $0x130] sm:$0xf]  ;;  %v1431_v11 = vld [vmem:[#allocation7 + $0x134] sm:$0xf0]  ;;  %v1059_v13 = vor.u32 %v1399_v3, %v1058_v2 }
  0x2e   :  { %664 = vmatpush.bf16.msrb.mxu2 %v1211_v47  ;;  %v1413_v12 = vld [vmem:[#allocation7 + $0xa4] sm:$0xf0]  ;;  %v1266_v14 = vld [vmem:[#allocation7 + $0x1d0] sm:$0xf]  ;;  %v1451_v15 = vld [vmem:[#allocation7 + $0x1d4] sm:$0xf0]  ;;  %v1187_v19 = vor.u32 %v1431_v11, %v1186_v10 }
  0x2f   :  { %676 = vmatpush.bf16.msra.mxu3 %v1283_v62  ;;  %v1050_v16 = vld [vmem:[#allocation7 + $0x20] sm:$0xf]  ;;  %v1397_v17 = vld [vmem:[#allocation7 + $0x24] sm:$0xf0]  ;;  %v1267_v18 = vor.u32 %v1451_v15, %v1266_v14  ;;  %v1115_v21 = vor.u32 %v1413_v12, %v1114_v9  ;;  %v1106_v26 = vld [vmem:[#allocation7 + $0x90] sm:$0xf] }
  0x30   :  { %652 = vmatpush.bf16.msrb.mxu1 %v1139_v48  ;;  %639 = vmatpush.bf16.msra.mxu0 %v1075_v53  ;;  %v1178_v20 = vld [vmem:[#allocation7 + $0x120] sm:$0xf]  ;;  %v1429_v22 = vld [vmem:[#allocation7 + $0x124] sm:$0xf0]  ;;  %v1411_v27 = vld [vmem:[#allocation7 + $0x94] sm:$0xf0]  ;;  %v1051_v28 = vor.u32 %v1397_v17, %v1050_v16 }
  0x31   :  { %v1258_v23 = vld [vmem:[#allocation7 + $0x1c0] sm:$0xf]  ;;  %v1449_v24 = vld [vmem:[#allocation7 + $0x1c4] sm:$0xf0]  ;;  %v1042_v29 = vld [vmem:[#allocation7 + $0x10] sm:$0xf]  ;;  %v1179_v32 = vor.u32 %v1429_v22, %v1178_v20  ;;  %v1107_v33 = vor.u32 %v1411_v27, %v1106_v26 }
  0x32   :  { %665 = vmatpush.bf16.msrb.mxu2 %v1203_v56  ;;  %v1395_v30 = vld [vmem:[#allocation7 + $0x14] sm:$0xf0]  ;;  %v1259_v31 = vor.u32 %v1449_v24, %v1258_v23  ;;  %v1170_v34 = vld [vmem:[#allocation7 + $0x110] sm:$0xf]  ;;  %v1098_v36 = vld [vmem:[#allocation7 + $0x80] sm:$0xf] }
  0x33   :  { %677 = vmatpush.bf16.msra.mxu3 %v1275_v7  ;;  %v1427_v35 = vld [vmem:[#allocation7 + $0x114] sm:$0xf0]  ;;  %v1409_v37 = vld [vmem:[#allocation7 + $0x84] sm:$0xf0]  ;;  %v1422_v38 = vld [vmem:[#allocation7 + $0xf4] sm:$0xf]  ;;  %v1043_v39 = vor.u32 %v1395_v30, %v1042_v29 }
  0x34   :  { %653 = vmatpush.bf16.msrb.mxu1 %v1131_v59  ;;  %640 = vmatpush.bf16.msra.mxu0 %v1067_v1  ;;  %v1034_v40 = vld [vmem:[#allocation7] sm:$0xf]  ;;  %v1393_v41 = vld [vmem:[#allocation7 + $0x4] sm:$0xf0]  ;;  %v1171_v42 = vor.u32 %v1427_v35, %v1170_v34  ;;  %v1406_v43 = vld [vmem:[#allocation7 + $0x74] sm:$0xf]  ;;  %v1099_v45 = vor.u32 %v1409_v37, %v1098_v36 }
  0x35   :  { %v1092_v44 = vld [vmem:[#allocation7 + $0x78] sm:$0xf0]  ;;  %v1162_v46 = vld [vmem:[#allocation7 + $0x100] sm:$0xf]  ;;  %v1425_v47 = vld [vmem:[#allocation7 + $0x104] sm:$0xf0]  ;;  %v1035_v49 = vor.u32 %v1393_v41, %v1034_v40 }
  0x36   :  { %666 = vmatpush.bf16.msrb.mxu2 %v1195_v6  ;;  %1031 = vmatmul.msk.bf16.vlgmr.msrb.gmra.mxu3 %vm183_vm0, %v1726_v25  ;;  %v1156_v25 = vld [vmem:[#allocation7 + $0xf8] sm:$0xf0]  ;;  %v1438_v50 = vld [vmem:[#allocation7 + $0x174] sm:$0xf]  ;;  %v1420_v52 = vld [vmem:[#allocation7 + $0xe4] sm:$0xf]  ;;  %v1095_v54 = vor.u32 %v1406_v43, %v1092_v44  ;;  %v1163_v55 = vor.u32 %v1425_v47, %v1162_v46 }
  0x37   :  { %678 = vmatpush.bf16.msra.mxu3 %v1267_v18  ;;  %v1159_v48 = vor.u32 %v1422_v38, %v1156_v25  ;;  %v1220_v51 = vld [vmem:[#allocation7 + $0x178] sm:$0xf0]  ;;  %v1148_v53 = vld [vmem:[#allocation7 + $0xe8] sm:$0xf0]  ;;  %v1418_v58 = vld [vmem:[#allocation7 + $0xd4] sm:$0xf] }
  0x38   :  { %654 = vmatpush.bf16.msrb.mxu1 %v1123_v8  ;;  %641 = vmatpush.bf16.msra.mxu0 %v1059_v13  ;;  %v1223_v56 = vor.u32 %v1438_v50, %v1220_v51  ;;  %v1151_v57 = vor.u32 %v1420_v52, %v1148_v53  ;;  %v1140_v59 = vld [vmem:[#allocation7 + $0xd8] sm:$0xf0]  ;;  %v1250_v61 = vld [vmem:[#allocation7 + $0x1b0] sm:$0xf]  ;;  %v1447_v62 = vld [vmem:[#allocation7 + $0x1b4] sm:$0xf0] }
  0x39   :  { %v1143_v60 = vor.u32 %v1418_v58, %v1140_v59  ;;  %v1251_v63 = vor.u32 %v1447_v62, %v1250_v61  ;;  %v1404_v0 = vld [vmem:[#allocation7 + $0x64] sm:$0xf]  ;;  %v1084_v1 = vld [vmem:[#allocation7 + $0x68] sm:$0xf0]  ;;  %v1242_v9 = vld [vmem:[#allocation7 + $0x1a0] sm:$0xf] }
  0x3a   :  { %667 = vmatpush.bf16.msrb.mxu2 %v1187_v19  ;;  %v1436_v2 = vld [vmem:[#allocation7 + $0x164] sm:$0xf]  ;;  %v1087_v3 = vor.u32 %v1404_v0, %v1084_v1  ;;  %v1212_v4 = vld [vmem:[#allocation7 + $0x168] sm:$0xf0]  ;;  %v1445_v10 = vld [vmem:[#allocation7 + $0x1a4] sm:$0xf0] }
  0x3b   :  { %679 = vmatpush.bf16.msra.mxu3 %v1259_v31  ;;  %v1215_v5 = vor.u32 %v1436_v2, %v1212_v4  ;;  %v1416_v6 = vld [vmem:[#allocation7 + $0xc4] sm:$0xf]  ;;  %v1132_v7 = vld [vmem:[#allocation7 + $0xc8] sm:$0xf0]  ;;  %v1243_v11 = vor.u32 %v1445_v10, %v1242_v9  ;;  %v1402_v12 = vld [vmem:[#allocation7 + $0x54] sm:$0xf] }
  0x3c   :  { %655 = vmatpush.bf16.msrb.mxu1 %v1115_v21  ;;  %642 = vmatpush.bf16.msra.mxu0 %v1051_v28  ;;  %v1135_v8 = vor.u32 %v1416_v6, %v1132_v7  ;;  %v1076_v13 = vld [vmem:[#allocation7 + $0x58] sm:$0xf0]  ;;  %v1434_v14 = vld [vmem:[#allocation7 + $0x154] sm:$0xf]  ;;  %v1234_v21 = vld [vmem:[#allocation7 + $0x190] sm:$0xf] }
  0x3d   :  { %v1079_v15 = vor.u32 %v1402_v12, %v1076_v13  ;;  %v1204_v16 = vld [vmem:[#allocation7 + $0x158] sm:$0xf0]  ;;  %v1414_v18 = vld [vmem:[#allocation7 + $0xb4] sm:$0xf]  ;;  %v1443_v22 = vld [vmem:[#allocation7 + $0x194] sm:$0xf0] }
  0x3e   :  { %668 = vmatpush.bf16.msrb.mxu2 %v1179_v32  ;;  %v1207_v17 = vor.u32 %v1434_v14, %v1204_v16  ;;  %v1124_v19 = vld [vmem:[#allocation7 + $0xb8] sm:$0xf0]  ;;  %v1235_v23 = vor.u32 %v1443_v22, %v1234_v21  ;;  %v1400_v24 = vld [vmem:[#allocation7 + $0x44] sm:$0xf]  ;;  %v1068_v26 = vld [vmem:[#allocation7 + $0x48] sm:$0xf0] }
  0x3f   :  { %680 = vmatpush.bf16.msra.mxu3 %v1251_v63  ;;  %v1127_v20 = vor.u32 %v1414_v18, %v1124_v19  ;;  %v1432_v27 = vld [vmem:[#allocation7 + $0x144] sm:$0xf]  ;;  %v1071_v28 = vor.u32 %v1400_v24, %v1068_v26  ;;  %v1196_v29 = vld [vmem:[#allocation7 + $0x148] sm:$0xf0]  ;;  %v1226_v34 = vld [vmem:[#allocation7 + $0x180] sm:$0xf] }
  0x40   :  { %656 = vmatpush.bf16.msrb.mxu1 %v1107_v33  ;;  %643 = vmatpush.bf16.msra.mxu0 %v1043_v39  ;;  %v1199_v30 = vor.u32 %v1432_v27, %v1196_v29  ;;  %v1412_v31 = vld [vmem:[#allocation7 + $0xa4] sm:$0xf]  ;;  %v1116_v32 = vld [vmem:[#allocation7 + $0xa8] sm:$0xf0]  ;;  %v1441_v35 = vld [vmem:[#allocation7 + $0x184] sm:$0xf0] }
  0x41   :  { %v1119_v33 = vor.u32 %v1412_v31, %v1116_v32  ;;  %v1227_v36 = vor.u32 %v1441_v35, %v1226_v34  ;;  %v1398_v37 = vld [vmem:[#allocation7 + $0x34] sm:$0xf]  ;;  %v1060_v38 = vld [vmem:[#allocation7 + $0x38] sm:$0xf0]  ;;  %v1396_v47 = vld [vmem:[#allocation7 + $0x24] sm:$0xf] }
  0x42   :  { %669 = vmatpush.bf16.msrb.mxu2 %v1171_v42  ;;  %v1430_v39 = vld [vmem:[#allocation7 + $0x134] sm:$0xf]  ;;  %v1063_v25 = vor.u32 %v1398_v37, %v1060_v38  ;;  %v1188_v40 = vld [vmem:[#allocation7 + $0x138] sm:$0xf0]  ;;  %v1428_v50 = vld [vmem:[#allocation7 + $0x124] sm:$0xf] }
  0x43   :  { %681 = vmatpush.bf16.msra.mxu3 %v1243_v11  ;;  %v1454_v41 = vld [vmem:[#allocation7 + $0x1f4] sm:$0xf]  ;;  %v1284_v42 = vld [vmem:[#allocation7 + $0x1f8] sm:$0xf0]  ;;  %v1191_v43 = vor.u32 %v1430_v39, %v1188_v40  ;;  %v1180_v51 = vld [vmem:[#allocation7 + $0x128] sm:$0xf0] }
  0x44   :  { %657 = vmatpush.bf16.msrb.mxu1 %v1099_v45  ;;  %644 = vmatpush.bf16.msra.mxu0 %v1035_v49  ;;  %v1287_v44 = vor.u32 %v1454_v41, %v1284_v42  ;;  %v1410_v45 = vld [vmem:[#allocation7 + $0x94] sm:$0xf]  ;;  %v1108_v46 = vld [vmem:[#allocation7 + $0x98] sm:$0xf0]  ;;  %v1052_v49 = vld [vmem:[#allocation7 + $0x28] sm:$0xf0]  ;;  %v1183_v53 = vor.u32 %v1428_v50, %v1180_v51 }
  0x45   :  { %v1055_v52 = vor.u32 %v1396_v47, %v1052_v49  ;;  %v1100_v58 = vld [vmem:[#allocation7 + $0x88] sm:$0xf0]  ;;  %v1044_v61 = vld [vmem:[#allocation7 + $0x18] sm:$0xf0]  ;;  %v1426_v62 = vld [vmem:[#allocation7 + $0x114] sm:$0xf] }
  0x46   :  { %670 = vmatpush.bf16.msrb.mxu2 %v1163_v55  ;;  %v1276_v55 = vld [vmem:[#allocation7 + $0x1e8] sm:$0xf0]  ;;  %v1172_v0 = vld [vmem:[#allocation7 + $0x118] sm:$0xf0]  ;;  %v1450_v1 = vld [vmem:[#allocation7 + $0x1d4] sm:$0xf] }
  0x47   :  { %682 = vmatpush.bf16.msra.mxu3 %v1235_v23  ;;  %v1268_v2 = vld [vmem:[#allocation7 + $0x1d8] sm:$0xf0]  ;;  %v1036_v6 = vld [vmem:[#allocation7 + $0x8] sm:$0xf0]  ;;  %v1424_v7 = vld [vmem:[#allocation7 + $0x104] sm:$0xf] }
  0x48   :  { %702 = vmatpush.bf16.msra.mxu1 %v1159_v48  ;;  %689 = vmatpush.bf16.msrb.mxu0 %v1095_v54  ;;  %v1111_v48 = vor.u32 %v1410_v45, %v1108_v46  ;;  %v1452_v54 = vld [vmem:[#allocation7 + $0x1e4] sm:$0xf]  ;;  %v1271_v4 = vor.u32 %v1450_v1, %v1268_v2  ;;  %v1164_v9 = vld [vmem:[#allocation7 + $0x108] sm:$0xf0]  ;;  %v133_v14 = vld [vmem:[#allocation6] sm:$0xf] }
  0x49   :  { %v1448_v10 = vld [vmem:[#allocation7 + $0x1c4] sm:$0xf]  ;;  %v1260_v11 = vld [vmem:[#allocation7 + $0x1c8] sm:$0xf0]  ;;  %v1167_v12 = vor.u32 %v1424_v7, %v1164_v9  ;;  %v1252_v16 = vld [vmem:[#allocation7 + $0x1b8] sm:$0xf0] }
  0x4a   :  { %715 = vmatpush.bf16.msra.mxu2 %v1223_v56  ;;  %v1408_v56 = vld [vmem:[#allocation7 + $0x84] sm:$0xf]  ;;  %v1263_v13 = vor.u32 %v1448_v10, %v1260_v11  ;;  %v136_v18 = vperm.slane %v133_v14, 1  ;;  %v1442_v23 = vld [vmem:[#allocation7 + $0x194] sm:$0xf]  ;;  %v135_v27 = vperm.slane %v133_v14, 0 }
  0x4b   :  { %683 = vmatpush.bf16.msra.mxu3 %v1227_v36  ;;  %v1103_v59 = vor.u32 %v1408_v56, %v1100_v58  ;;  %v1444_v19 = vld [vmem:[#allocation7 + $0x1a4] sm:$0xf]  ;;  %v1236_v24 = vld [vmem:[#allocation7 + $0x198] sm:$0xf0]  ;;  %v137_v29 = vperm.slane %v133_v14, 2  ;;  %v138_v45 = vperm.slane %v133_v14, 3 }
  0x4c   :  { %703 = vmatpush.bf16.msra.mxu1 %v1151_v57  ;;  %690 = vmatpush.bf16.msrb.mxu0 %v1087_v3  ;;  %v1279_v57 = vor.u32 %v1452_v54, %v1276_v55  ;;  %v1175_v3 = vor.u32 %v1426_v62, %v1172_v0  ;;  %v1440_v31 = vld [vmem:[#allocation7 + $0x184] sm:$0xf]  ;;  %v1228_v32 = vld [vmem:[#allocation7 + $0x188] sm:$0xf0]  ;;  %v1463_v51 = vld [vmem:[#allocation9 + $0x38] sm:$0xff] }
  0x4d   :  { %v1231_v38 = vor.u32 %v1440_v31, %v1228_v32  ;;  %v1460_v54 = vld [vmem:[#allocation9 + $0x20] sm:$0xff]  ;;  %v1459_v55 = vld [vmem:[#allocation9 + $0x18] sm:$0xff]  ;;  %v1470_v58 = vld [vmem:[#allocation9 + $0x70] sm:$0xff] }
  0x4e   :  { %716 = vmatpush.bf16.msra.mxu2 %v1215_v5  ;;  %v1392_v5 = vld [vmem:[#allocation7 + $0x4] sm:$0xf]  ;;  %v1471_v56 = vld [vmem:[#allocation9 + $0x78] sm:$0xff]  ;;  %v1466_v1 = vld [vmem:[#allocation9 + $0x50] sm:$0xff] }
  0x4f   :  { %728 = vmatpush.bf16.msrb.mxu3 %v1287_v44  ;;  %v1468_v62 = vld [vmem:[#allocation9 + $0x60] sm:$0xff]  ;;  %v1467_v0 = vld [vmem:[#allocation9 + $0x58] sm:$0xff] }
  0x50   :  { %704 = vmatpush.bf16.msra.mxu1 %v1143_v60  ;;  %691 = vmatpush.bf16.msrb.mxu0 %v1079_v15  ;;  %v1394_v60 = vld [vmem:[#allocation7 + $0x14] sm:$0xf]  ;;  %v1479_v11 = vld [vmem:[#allocation10 + $0x38] sm:$0xff] }
  0x51   :  { %v1047_v63 = vor.u32 %v1394_v60, %v1044_v61  ;;  %v1446_v15 = vld [vmem:[#allocation7 + $0x1b4] sm:$0xf]  ;;  %v1469_v60 = vld [vmem:[#allocation9 + $0x68] sm:$0xff]  ;;  %v1456_v61 = vld [vmem:[#allocation9] sm:$0xff] }
  0x52   :  { %717 = vmatpush.bf16.msra.mxu2 %v1207_v17  ;;  %v1255_v17 = vor.u32 %v1446_v15, %v1252_v16  ;;  %v1478_v15 = vld [vmem:[#allocation10 + $0x30] sm:$0xff] }
  0x53   :  { %729 = vmatpush.bf16.msrb.mxu3 %v1279_v57  ;;  %v1458_v57 = vld [vmem:[#allocation9 + $0x10] sm:$0xff] }
  0x54   :  { %705 = vmatpush.bf16.msra.mxu1 %v1135_v8  ;;  %692 = vmatpush.bf16.msrb.mxu0 %v1071_v28  ;;  %v1039_v8 = vor.u32 %v1392_v5, %v1036_v6  ;;  %v311_v6 = vld [vmem:[%s1752_s4] sm:$0x3] }
  0x55   :  { %v313_v9 = vperm.slane %v311_v6, 0 }
  0x56   :  { %718 = vmatpush.bf16.msra.mxu2 %v1199_v30  ;;  %v1239_v30 = vor.u32 %v1442_v23, %v1236_v24  ;;  %v314_v24 = vperm.slane %v311_v6, 1 }
  0x57   :  { %730 = vmatpush.bf16.msrb.mxu3 %v1271_v4  ;;  %v1465_v4 = vld [vmem:[#allocation9 + $0x48] sm:$0xff] }
  0x58   :  { %706 = vmatpush.bf16.msra.mxu1 %v1127_v20  ;;  %693 = vmatpush.bf16.msrb.mxu0 %v1063_v25  ;;  %v1244_v20 = vld [vmem:[#allocation7 + $0x1a8] sm:$0xf0] }
  0x59   :  { %v1247_v21 = vor.u32 %v1444_v19, %v1244_v20 }
  0x5a   :  { %719 = vmatpush.bf16.msra.mxu2 %v1191_v43 }
  0x5b   :  { %731 = vmatpush.bf16.msrb.mxu3 %v1263_v13 }
  0x5c   :  { %707 = vmatpush.bf16.msra.mxu1 %v1119_v33  ;;  %694 = vmatpush.bf16.msrb.mxu0 %v1055_v52  ;;  %v1462_v52 = vld [vmem:[#allocation9 + $0x30] sm:$0xff] }
  0x5e   :  { %720 = vmatpush.bf16.msra.mxu2 %v1183_v53  ;;  %v1461_v53 = vld [vmem:[#allocation9 + $0x28] sm:$0xff] }
  0x5f   :  { %732 = vmatpush.bf16.msrb.mxu3 %v1255_v17 }
  0x60   :  { %708 = vmatpush.bf16.msra.mxu1 %v1111_v48  ;;  %695 = vmatpush.bf16.msrb.mxu0 %v1047_v63 }
  0x62   :  { %721 = vmatpush.bf16.msra.mxu2 %v1175_v3 }
  0x63   :  { %733 = vmatpush.bf16.msrb.mxu3 %v1247_v21 }
  0x64   :  { %709 = vmatpush.bf16.msra.mxu1 %v1103_v59  ;;  %696 = vmatpush.bf16.msrb.mxu0 %v1039_v8  ;;  %v1457_v59 = vld [vmem:[#allocation9 + $0x8] sm:$0xff]  ;;  %v1464_v8 = vld [vmem:[#allocation9 + $0x40] sm:$0xff] }
  0x66   :  { %722 = vmatpush.bf16.msra.mxu2 %v1167_v12 }
  0x67   :  { %734 = vmatpush.bf16.msrb.mxu3 %v1239_v30 }
  0x6b   :  { %735 = vmatpush.bf16.msrb.mxu3 %v1231_v38  ;;  %v1476_v38 = vld [vmem:[#allocation10 + $0x20] sm:$0xff] }
  0xa4   :  { %v209_v22 = vpop.f32.mrf.mxu1 }
  0xa5   :  { %v210_v26 = vadd.f32 %v209_v22, %v136_v18 }
  0xa7   :  { %v240_v28 = vmax.f32 %v210_v26, 0.0 }
  0xa9   :  { %v244_v33 = vpack.c.bf16 %v240_v28, %v240_v28  ;;  %v196_v34 = vpop.f32.mrf.mxu3 }
  0xaa   :  { %v197_v35 = vadd.f32 %v196_v34, %v135_v27 }
  0xab   :  { %658 = vmatmul.bf16.vlgmr.msrb.gmra.mxu1 %v244_v33 }
  0xac   :  { %v222_v36 = vpop.f32.mrf.mxu2  ;;  %v239_v39 = vmax.f32 %v197_v35, 0.0  ;;  %v211_v25 = vpop.f32.mrf.mxu1  ;;  %890 = vmatpush.bf16.msrb.mxu1 %v1471_v56 }
  0xad   :  { %v223_v37 = vadd.f32 %v222_v36, %v137_v29  ;;  %v1474_v25 = vld [vmem:[#allocation10 + $0x10] sm:$0xff] }
  0xae   :  { %v243_v41 = vpack.c.bf16 %v239_v39, %v239_v39  ;;  %v1475_v39 = vld [vmem:[#allocation10 + $0x18] sm:$0xff] }
  0xaf   :  { %v241_v40 = vmax.f32 %v223_v37, 0.0  ;;  %v1477_v37 = vld [vmem:[#allocation10 + $0x28] sm:$0xff] }
  0xb0   :  { %645 = vmatmul.bf16.vlgmr.msra.gmra.mxu0 %v243_v41  ;;  %891 = vmatpush.bf16.msrb.mxu1 %v1470_v58 }
  0xb1   :  { %v245_v42 = vpack.c.bf16 %v241_v40, %v241_v40  ;;  %v198_v43 = vpop.f32.mrf.mxu3  ;;  %877 = vmatpush.bf16.msra.mxu0 %v1463_v51  ;;  %v1473_v40 = vld [vmem:[#allocation10 + $0x8] sm:$0xff]  ;;  %v1493_v51 = vld [vmem:[%s1756_s8] ss:$0 sm:$0xff] }
  0xb3   :  { %671 = vmatmul.bf16.vlgmr.msrb.gmra.mxu2 %v245_v42 }
  0xb4   :  { %v224_v44 = vpop.f32.mrf.mxu2  ;;  %892 = vmatpush.bf16.msrb.mxu1 %v1469_v60  ;;  %973 = vmatpush.bf16.msrb.mxu2 %v1479_v11 }
  0xb5   :  { %878 = vmatpush.bf16.msra.mxu0 %v1462_v52  ;;  %v1492_v44 = vld [vmem:[%s1754_s6] ss:$0 sm:$0xff] }
  0xb8   :  { %893 = vmatpush.bf16.msrb.mxu1 %v1468_v62  ;;  %974 = vmatpush.bf16.msrb.mxu2 %v1478_v15 }
  0xb9   :  { %v235_v46 = vpop.f32.mrf.mxu3  ;;  %879 = vmatpush.bf16.msra.mxu0 %v1461_v53 }
  0xba   :  { %v236_v47 = vadd.f32 %v235_v46, %v138_v45 }
  0xbb   :  { %710 = vmatmul.bf16.vlgmr.msra.gmra.mxu1 %v244_v33 }
  0xbc   :  { %v242_v48 = vmax.f32 %v236_v47, 0.0  ;;  %894 = vmatpush.bf16.msrb.mxu1 %v1467_v0  ;;  %975 = vmatpush.bf16.msrb.mxu2 %v1477_v37 }
  0xbd   :  { %880 = vmatpush.bf16.msra.mxu0 %v1460_v54 }
  0xbe   :  { %v246_v49 = vpack.c.bf16 %v242_v48, %v242_v48 }
  0xc0   :  { %684 = vmatmul.bf16.vlgmr.msra.gmra.mxu3 %v246_v49  ;;  %697 = vmatmul.bf16.vlgmr.msrb.gmra.mxu0 %v243_v41  ;;  %v1472_v41 = vld [vmem:[#allocation10] sm:$0xff] }
  0xc1   :  { %v237_v50 = vpop.f32.mrf.mxu3  ;;  %881 = vmatpush.bf16.msra.mxu0 %v1459_v55  ;;  %895 = vmatpush.bf16.msrb.mxu1 %v1466_v1 }
  0xc2   :  { %976 = vmatpush.bf16.msrb.mxu2 %v1476_v38 }
  0xc3   :  { %723 = vmatmul.bf16.vlgmr.msra.gmra.mxu2 %v245_v42 }
  0xc5   :  { %882 = vmatpush.bf16.msra.mxu0 %v1458_v57  ;;  %896 = vmatpush.bf16.msrb.mxu1 %v1465_v4 }
  0xc6   :  { %977 = vmatpush.bf16.msrb.mxu2 %v1475_v39 }
  0xc9   :  { %883 = vmatpush.bf16.msra.mxu0 %v1457_v59  ;;  %897 = vmatpush.bf16.msrb.mxu1 %v1464_v8 }
  0xca   :  { %978 = vmatpush.bf16.msrb.mxu2 %v1474_v25 }
  0xcd   :  { %884 = vmatpush.bf16.msra.mxu0 %v1456_v61 }
  0xce   :  { %979 = vmatpush.bf16.msrb.mxu2 %v1473_v40 }
  0xd0   :  { %736 = vmatmul.bf16.vlgmr.msrb.gmra.mxu3 %v246_v49 }
  0xd2   :  { %980 = vmatpush.bf16.msrb.mxu2 %v1472_v41 }
 0x128   :  { %v659_v63 = vpop.f32.mrf.mxu1 }
 0x12d   :  { %v646_v2 = vpop.f32.mrf.mxu0 }
 0x12e   :  { %v647_v12 = vadd.f32 %v646_v2, %v313_v9 }
 0x130   :  { %v661_v3 = vpop.f32.mrf.mxu1  ;;  %v660_v16 = vadd.f32 %v659_v63, %v647_v12 }
 0x135   :  { %v648_v7 = vpop.f32.mrf.mxu0 }
 0x136   :  { %v672_v5 = vpop.f32.mrf.mxu2 }
 0x137   :  { %v673_v18 = vadd.f32 %v672_v5, %v660_v16 }
 0x138   :  { %v711_v10 = vpop.f32.mrf.mxu1 }
 0x13d   :  { %v698_v14 = vpop.f32.mrf.mxu0 }
 0x13e   :  { %v674_v13 = vpop.f32.mrf.mxu2  ;;  %v699_v28 = vadd.f32 %v698_v14, %v314_v24 }
 0x140   :  { %v713_v17 = vpop.f32.mrf.mxu1  ;;  %v712_v30 = vadd.f32 %v711_v10, %v699_v28 }
 0x143   :  { %v685_v19 = vpop.f32.mrf.mxu3 }
 0x144   :  { %v686_v20 = vadd.f32 %v685_v19, %v673_v18 }
 0x145   :  { %v700_v22 = vpop.f32.mrf.mxu0 }
 0x146   :  { %v724_v21 = vpop.f32.mrf.mxu2  ;;  %v741_v23 = vmax.f32 %v686_v20, 0.0 }
 0x147   :  { %v725_v31 = vadd.f32 %v724_v21, %v712_v30 }
 0x148   :  { %v743_v26 = vpack.c.bf16 %v741_v23, %v741_v23 }
 0x14a   :  { %885 = vmatmul.bf16.vlgmr.msra.gmra.mxu0 %v743_v26 }
 0x14b   :  { %v687_v27 = vpop.f32.mrf.mxu3 }
 0x14e   :  { %v726_v29 = vpop.f32.mrf.mxu2 }
 0x153   :  { %v737_v32 = vpop.f32.mrf.mxu3 }
 0x154   :  { %v738_v33 = vadd.f32 %v737_v32, %v725_v31 }
 0x156   :  { %v742_v34 = vmax.f32 %v738_v33, 0.0 }
 0x158   :  { %v744_v35 = vpack.c.bf16 %v742_v34, %v742_v34 }
 0x15a   :  { %898 = vmatmul.bf16.vlgmr.msrb.gmra.mxu1 %v744_v35 }
 0x15b   :  { %v739_v36 = vpop.f32.mrf.mxu3 }
 0x1c7   :  { %v886_v42 = vpop.f32.mrf.mxu0 }
 0x1c8   :  { %v887_v45 = vadd.f32 %v1492_v44, %v886_v42 }
 0x1cf   :  { %v888_v43 = vpop.f32.mrf.mxu0 }
 0x1d7   :  { %v899_v46 = vpop.f32.mrf.mxu1 }
 0x1d8   :  { %v900_v47 = vadd.f32 %v899_v46, %v887_v45 }
 0x1da   :  { %v903_v48 = vmax.f32 %v900_v47, 0.0 }
 0x1dc   :  { %v904_v49 = vpack.c.bf16 %v903_v48, %v903_v48 }
 0x1de   :  { %981 = vmatmul.bf16.vlgmr.msrb.gmra.mxu2 %v904_v49 }
 0x1df   :  { %v901_v50 = vpop.f32.mrf.mxu1 }
 0x261   :  { %v982_v52 = vpop.f32.mrf.mxu2 }
 0x262   :  { %v983_v53 = vadd.f32 %v1493_v51, %v982_v52 }
 0x264   :  { %987 = vst.msk [vmem:[%s1757_s9] sm:$0xff] %vm986_vm1, %v983_v53 }
 0x269   :  { %v984_v54 = vpop.f32.mrf.mxu2 }
 0x26a   :  { %992 = vsyncpa [#allocation3], 1 }
 0x26b   :  { %993 = vsyncpa [#allocation5], 1 }
 0x26c   :  { %994 = vsyncpa [#allocation8], 1 }
 0x26d   :  { %995 = vsyncpa [#allocation11], 1 }

</bundles_post_ra>
